<compile_context>
chip_gen: v7x
topology: tpu7x:2x2x1
jax: 0.10.0
libtpu: 0.0.40
codegen_flags: <defaults>
</compile_context>

<pallas_src>
import functools

import jax
import jax.numpy as jnp
from jax import lax
from jax.experimental import pallas as pl
from jax.experimental.pallas import tpu as pltpu


def _head_kernel(x_ref, wqkv_ref, o_ref, *, head_size, mxu_dtype):
    # x_ref:    (1, T, C)  one batch element
    # wqkv_ref: (C, 3*H)   fused [Wq*scale | Wk | Wv] (already transposed)
    # o_ref:    (1, T, H)
    H = head_size

    x = x_ref[0]                       # (T, C)
    w = wqkv_ref[...]                  # (C, 3H)

    # One fused projection matmul: (T, C) @ (C, 3H) -> (T, 3H), f32 accumulation.
    qkv = jnp.dot(x.astype(mxu_dtype), w.astype(mxu_dtype),
                  preferred_element_type=jnp.float32)
    q = qkv[:, :H]                     # scale already folded into Wq
    k = qkv[:, H:2 * H]
    v = qkv[:, 2 * H:]

    # Scores (T, T), contracting k's feature dim directly (no explicit k.T,
    # no XLU transpose on the critical path).
    s = lax.dot_general(
        q.astype(mxu_dtype), k.astype(mxu_dtype),
        dimension_numbers=(((1,), (1,)), ((), ())),
        preferred_element_type=jnp.float32)

    # Causal mask: large finite negative (NaN-safe) instead of -inf.
    T = s.shape[0]
    row = lax.broadcasted_iota(jnp.int32, (T, T), 0)
    col = lax.broadcasted_iota(jnp.int32, (T, T), 1)
    s = jnp.where(col <= row, s, jnp.float32(-1e30))

    # Numerically stable softmax, exact f32 divide (denominator is only (T, 1)).
    s = s - jnp.max(s, axis=-1, keepdims=True)
    e = jnp.exp(s)
    p = e / jnp.sum(e, axis=-1, keepdims=True)

    # dropout (eval mode) == identity

    o_ref[0] = jnp.dot(p.astype(mxu_dtype), v.astype(mxu_dtype),
                       preferred_element_type=jnp.float32).astype(o_ref.dtype)


def fuse_head_weights(wq_t, wk_t, wv_t, n_embed):
    """Build the fused (C, 3H) QKV weight ONCE at init.

    Folds the 1/sqrt(n_embed) attention scale into Wq so the kernel never
    multiplies the (T, T) score matrix by a scalar.
    """
    scale = float(n_embed) ** (-0.5)          # matches the PyTorch module (C = n_embed)
    return jnp.concatenate([wq_t * scale, wk_t, wv_t], axis=1)


def head_forward(x, wqkv, *, mxu_dtype=jnp.float32):
    """Forward pass of `Head`.

    x:     (B, T, C) float32
    wqkv:  (C, 3H) fused weight from fuse_head_weights()
    mxu_dtype: operand dtype for the MXU matmuls.  bf16 is valid on v5e/v6e/v7x
               (native MXU path) and recommended at larger shapes; default f32
               preserves the PyTorch module's f32 semantics.  Accumulation is
               always f32 (preferred_element_type).
    """
    B, T, C = x.shape
    H = wqkv.shape[1] // 3

    kernel = functools.partial(_head_kernel, head_size=H, mxu_dtype=mxu_dtype)

    return pl.pallas_call(
        kernel,
        out_shape=jax.ShapeDtypeStruct((B, T, H), x.dtype),
        grid=(B,),
        in_specs=[
            pl.BlockSpec((1, T, C), lambda b: (b, 0, 0)),
            pl.BlockSpec((C, 3 * H), lambda b: (0, 0)),   # constant block: no re-DMA
        ],
        out_specs=pl.BlockSpec((1, T, H), lambda b: (b, 0, 0)),
        compiler_params=pltpu.CompilerParams(
            dimension_semantics=("parallel",)),           # megacore-shards B on v7x
    )(x, wqkv)


def _reference(x, wq_t, wk_t, wv_t):
    B, T, C = x.shape
    q = x @ wq_t
    k = x @ wk_t
    v = x @ wv_t
    w = (q @ jnp.swapaxes(k, -2, -1)) * (C ** -0.5)
    tril = jnp.tril(jnp.ones((T, T)))
    w = jnp.where(tril == 0, -jnp.inf, w)
    w = jax.nn.softmax(w, axis=-1)
    return w @ v


if __name__ == "__main__":
    # config: n_embed=32, seq_len=8, head_size=16, dropout -> eval (identity)
    B, T, C, H = 2, 8, 32, 16

    key = jax.random.PRNGKey(0)
    kx, kq, kk, kv = jax.random.split(key, 4)
    x = jax.random.normal(kx, (B, T, C), dtype=jnp.float32)

    # deterministic init of nn.Linear(n_embed, head_size, bias=False) weights,
    # stored here already transposed to (C, H) so y = x @ W
    bound = 1.0 / (C ** 0.5)
    wq_t = jax.random.uniform(kq, (C, H), minval=-bound, maxval=bound, dtype=jnp.float32)
    wk_t = jax.random.uniform(kk, (C, H), minval=-bound, maxval=bound, dtype=jnp.float32)
    wv_t = jax.random.uniform(kv, (C, H), minval=-bound, maxval=bound, dtype=jnp.float32)

    # Fused weight built once (init-time), outside the forward path.
    wqkv = fuse_head_weights(wq_t, wk_t, wv_t, C)

    out = head_forward(x, wqkv)
    out = jax.block_until_ready(out)

    ref = _reference(x, wq_t, wk_t, wv_t)
    assert out.shape == (B, T, H)
    assert jnp.allclose(out, ref, atol=1e-4, rtol=1e-4), "mismatch vs reference"

    print("KERNEL_OK")
</pallas_src>

<mosaic_0001>
module attributes {stable_mosaic.version = 11 : i64} {
  func.func @_head_kernel(%arg0: i32, %arg1: memref<1x8x32xf32, #tpu.memory_space<vmem>>, %arg2: memref<32x48xf32, #tpu.memory_space<vmem>>, %arg3: memref<1x8x16xf32, #tpu.memory_space<vmem>>) attributes {dimension_semantics = [#tpu.dimension_semantics<parallel>], iteration_bounds = array<i64: 2>, scalar_prefetch = 0 : i64, scratch_operands = 0 : i64, tpu.core_type = #tpu.core_type<tc>, window_params = [{transform_indices = @transform_0, window_bounds = array<i64: 1, 8, 32>}, {pipeline_mode = #tpu.pipeline_mode<synchronous>, transform_indices = @transform_1, window_bounds = array<i64: 32, 48>}, {transform_indices = @transform_2, window_bounds = array<i64: 1, 8, 16>}]} {
    %c0 = arith.constant 0 : index
    %c0_0 = arith.constant 0 : index
    %c0_1 = arith.constant 0 : index
    %0 = vector.load %arg1[%c0, %c0_0, %c0_1] : memref<1x8x32xf32, #tpu.memory_space<vmem>>, vector<1x8x32xf32>
    %1 = vector.shape_cast %0 : vector<1x8x32xf32> to vector<8x32xf32>
    %c0_2 = arith.constant 0 : index
    %c0_3 = arith.constant 0 : index
    %2 = vector.load %arg2[%c0_2, %c0_3] : memref<32x48xf32, #tpu.memory_space<vmem>>, vector<32x48xf32>
    %cst = arith.constant dense<0.000000e+00> : vector<8x48xf32>
    %3 = tpu.matmul %1, %2, %cst {dimension_numbers = #tpu.dot_dimension_numbers<[1], [0], [0], [1], [0, 0, 1, 1], [], []>} : vector<8x32xf32>, vector<32x48xf32>, vector<8x48xf32> -> vector<8x48xf32>
    %4 = vector.extract_strided_slice %3 {offsets = [0, 0], sizes = [8, 16], strides = [1, 1]} : vector<8x48xf32> to vector<8x16xf32>
    %5 = vector.extract_strided_slice %3 {offsets = [0, 16], sizes = [8, 16], strides = [1, 1]} : vector<8x48xf32> to vector<8x16xf32>
    %6 = vector.extract_strided_slice %3 {offsets = [0, 32], sizes = [8, 16], strides = [1, 1]} : vector<8x48xf32> to vector<8x16xf32>
    %cst_4 = arith.constant dense<0.000000e+00> : vector<8x8xf32>
    %7 = tpu.matmul %4, %5, %cst_4 {dimension_numbers = #tpu.dot_dimension_numbers<[1], [1], [0], [0], [0, 0, 1, 0], [], []>} : vector<8x16xf32>, vector<8x16xf32>, vector<8x8xf32> -> vector<8x8xf32>
    %8 = tpu.iota {dimensions = array<i32: 0>} : vector<8x8xi32>
    %9 = tpu.iota {dimensions = array<i32: 1>} : vector<8x8xi32>
    %10 = arith.cmpi sle, %9, %8 : vector<8x8xi32>
    %cst_5 = arith.constant -1.000000e+30 : f32
    %11 = vector.broadcast %cst_5 : f32 to vector<8x8xf32>
    %12 = arith.select %10, %7, %11 : vector<8x8xi1>, vector<8x8xf32>
    %cst_6 = arith.constant dense<0xFF800000> : vector<8xf32>
    %13 = vector.multi_reduction <maximumf>, %12, %cst_6 [1] : vector<8x8xf32> to vector<8xf32>
    %14 = vector.shape_cast %13 : vector<8xf32> to vector<8x1xf32>
    %15 = vector.broadcast %14 : vector<8x1xf32> to vector<8x8xf32>
    %16 = arith.subf %12, %15 : vector<8x8xf32>
    %17 = math.exp %16 : vector<8x8xf32>
    %cst_7 = arith.constant dense<0.000000e+00> : vector<8xf32>
    %18 = vector.multi_reduction <add>, %17, %cst_7 [1] : vector<8x8xf32> to vector<8xf32>
    %19 = vector.shape_cast %18 : vector<8xf32> to vector<8x1xf32>
    %20 = vector.broadcast %19 : vector<8x1xf32> to vector<8x8xf32>
    %21 = arith.divf %17, %20 : vector<8x8xf32>
    %cst_8 = arith.constant dense<0.000000e+00> : vector<8x16xf32>
    %22 = tpu.matmul %21, %6, %cst_8 {dimension_numbers = #tpu.dot_dimension_numbers<[1], [0], [0], [1], [0, 0, 1, 1], [], []>} : vector<8x8xf32>, vector<8x16xf32>, vector<8x16xf32> -> vector<8x16xf32>
    %c0_9 = arith.constant 0 : index
    %c0_10 = arith.constant 0 : index
    %c0_11 = arith.constant 0 : index
    %23 = vector.load %arg3[%c0_9, %c0_10, %c0_11] : memref<1x8x16xf32, #tpu.memory_space<vmem>>, vector<1x8x16xf32>
    %24 = vector.shape_cast %23 : vector<1x8x16xf32> to vector<8x16xf32>
    %25 = vector.shape_cast %22 : vector<8x16xf32> to vector<1x8x16xf32>
    tpu.vector_store %arg3[%c0_9, %c0_10, %c0_11], %25 {strides = array<i32>} : memref<1x8x16xf32, #tpu.memory_space<vmem>>, vector<1x8x16xf32>,
    return
  }
  func.func @transform_0(%arg0: i32) -> (i32, i32, i32) {
    %c0_i32 = arith.constant 0 : i32
    %c0_i32_0 = arith.constant 0 : i32
    %c0_i32_1 = arith.constant 0 : i32
    return %arg0, %c0_i32, %c0_i32_0 : i32, i32, i32
  }
  func.func @transform_1(%arg0: i32) -> (i32, i32) {
    %c0_i32 = arith.constant 0 : i32
    %c0_i32_0 = arith.constant 0 : i32
    %c0_i32_1 = arith.constant 0 : i32
    return %c0_i32, %c0_i32_0 : i32, i32
  }
  func.func @transform_2(%arg0: i32) -> (i32, i32, i32) {
    %c0_i32 = arith.constant 0 : i32
    %c0_i32_0 = arith.constant 0 : i32
    %c0_i32_1 = arith.constant 0 : i32
    return %arg0, %c0_i32, %c0_i32_0 : i32, i32, i32
  }
}

</mosaic_0001>

<bundles_post_ra>
// kernel: tpu_custom_call.1
= control target key start
LH: loop header
LB: loop body
LE: loop exit
PB: predicated region body
PF: predicated region fallthrough
CT: control target
= control target key end

     0   :  { %7 = vsyncpa [#allocation3], 0  ;;  %s1006_s0 = inlined_call_operand.hbm [shape: f32[2,8,32], index: 0, kind: input, shape index: {}]   ;;  %s1007_s1 = inlined_call_operand.hbm [shape: f32[32,48], index: 1, kind: input, shape index: {}]   ;;  %s1008_s2 = inlined_call_operand.hbm [shape: f32[2,8,16], index: 2, kind: output, shape index: {}]  }
   0x1   :  { %9 = vsyncpa [#allocation3 + $0x1], 0 }
   0x2   :  { %10 = vsyncpa [#allocation6], 0 }
   0x3   :  { %11 = vsyncpa [#allocation4], 0 }
   0x4   :  { %13 = vsyncpa [#allocation4 + $0x1], 0  ;;  %s797_s9 = smov 0   ;;  %s799_s10 = smov 0  }
   0x5   :  { %s801_s11 = smov 0   ;;  %s803_s12 = smov 0  }
   0x6 LB: > { %s818_s13 = sadd.s32 4294967295, %s770_s12   ;;  %s520_s14 = sadd.s32 4294967294, %s770_s12   ;;  %s770_s12 = sphi %s803_s12, %s1028_s12   ;;  %s766_s11 = sphi %s801_s11, %s1027_s11   ;;  %s762_s10 = sphi %s799_s10, %s1026_s10   ;;  %s758_s9 = sphi %s797_s9, %s1025_s9  }
   0x7   : > { %p39_p0 = scmp.ne.s32.totalorder %s762_s10, %s758_s9  ;;  %p1009_p1 = scmp.eq.s32.totalorder %s818_s13, 0 }
   0x8   : > { %p90_p3 = scmp.eq.s32.totalorder %s520_s14, 1  ;;  %p521_p5 = scmp.ge.s32.totalorder %s770_s12, 1 }
   0x9   : > { %p827_p4 = por %p1009_p1, %p39_p0  ;;  %p97_p7 = scmp.lt.s32.totalorder %s770_s12, 3 }
   0xa   : > { %p832_p6 = por %p90_p3, %p39_p0  ;;  %s772_s18 = smov [#allocation5]  }
   0xb   : > { %s1012_s15 = scalar_select %p827_p4, 1, 0 }
   0xc   : > { %s1013_s16 = scalar_select %p832_p6, 1, 0 }
   0xd   : > { %p837_p8 = pnand %p521_p5, %p97_p7  ;;  %s109_s19 = sshll.u32 %s772_s18, 4  ;;  %s841_s19 = int_to_ptr.vmem [resolvable:$true] %s109_s19 }
   0xe   : > { %s853_s21 = sadd.s32 1, %s770_s12   ;;  %s26_s22 = sadd.s32 1, %s766_s11 }
   0xf   : > { %s1014_s17 = scalar_select %p837_p8, 1, 0 }
  0x10   : > { %p582_p9 = pneg %p837_p8  ;;  %s23_s23 = ssub.s32 %s770_s12, %s853_s21 }
  0x11   : > { %s642_s26 = scalar_lea.hbm %s1007_s1, 512 }
  0x12   : > { %p848_p11 = pnand %p582_p9, %p1009_p1  ;;  %p643_p12 = scmp.ne.s32.totalorder %s1007_s1, %s642_s26 }
  0x13   : > { %p649_p5 = scmp.lt.u32.totalorder %s642_s26, %s1007_s1 }
  0x14   : > { %p644_p13 = pneg %p848_p11 }
  0x16   : > { %p645_p0 = pnand %p644_p13, %p643_p12 }
  0x18   : > { %p646_p3 = pneg %p645_p0 }
  0x1a   : > { %p651_p7 = pnand %p649_p5, %p646_p3 }
  0x1c   : > { %654 = shalt.err (!%p651_p7)
}
  0x1d   : > { %s655_s3 = scalar_lea.vmem %s841_s19, 512  ;;  %p663_p2 = scmp.lt.s32.totalorder %s841_s19, %s841_s19 }
  0x1e   : > { %p656_p9 = scmp.ne.s32.totalorder %s841_s19, %s655_s3  ;;  %p664_p6 = scmp.lt.s32.totalorder %s655_s3, %s655_s3 }
  0x20   : > { %p658_p10 = pnand %p656_p9, %p644_p13  ;;  %p665_p4 = por %p664_p6, %p663_p2 }
  0x22   : > { %p659_p1 = pneg %p658_p10 }
  0x24   : > { %p666_p8 = pnand %p665_p4, %p659_p1 }
  0x26   : > { %669 = shalt.err (!%p666_p8)
}
  0x27   : > { %s773_s4 = smov 128   ;;  %s774_s5 = smov 8  }
  0x28   : > { %585 = dma.hbm_to_vmem [thread:$0]  (!%p848_p11), %s1007_s1, 512, %s841_s19, [#allocation6], %s773_s4, %s773_s4, %s774_s5  }
  0x29   : > { %p24_p2 = scmp.eq.s32.totalorder %s23_s23, 0  ;;  %p33_p1 = scmp.ne.s32.totalorder %s766_s11, %s762_s10 }
  0x2a   : > { %p34_p4 = scmp.eq.s32.totalorder %s770_s12, 0  ;;  %p595_p6 = scmp.lt.s32.totalorder %s770_s12, 2 }
  0x2b   : > { %s884_s8 = scalar_select %p24_p2, %s766_s11, %s26_s22  }
  0x2c   : > { %p35_p8 = por %p34_p4, %p33_p1  ;;  %p1016_p10 = scmp.eq.s32.totalorder %s818_s13, 1 }
  0x2d   : > { %s123_s18 = sand.u32 1, %s766_s11   ;;  %s525_s24 = sshll.u32 %s770_s12, 7 }
  0x2e   : > { %p888_p12 = por %p1016_p10, %p33_p1  ;;  %s524_s25 = sshll.u32 %s123_s18, 3 }
  0x2f   : > { %s897_s27 = scalar_lea.hbm %s1006_s0, %s525_s24  ;;  %s127_s19 = scalar_lea.vmem [#allocation2], %s524_s25 }
  0x30   : > { %s134_s22 = sshll.u32 %s127_s19, 4  ;;  %p899_p11 = pnand %p595_p6, %p35_p8  ;;  %s903_s22 = int_to_ptr.vmem [resolvable:$true] %s134_s22 }
  0x31   : > { %s124_s28 = scalar_lea.sflag [#allocation3], %s123_s18  ;;  %s670_s29 = scalar_lea.hbm %s897_s27, 128 }
  0x32   : > { %p671_p13 = scmp.ne.s32.totalorder %s897_s27, %s670_s29  ;;  %p672_p0 = pneg %p899_p11 }
  0x33   : > { %s675_s4 = scalar_lea.hbm %s1006_s0, 256  ;;  %p676_p7 = scmp.lt.u32.totalorder %s897_s27, %s1006_s0 }
  0x34   : > { %p673_p3 = pnand %p672_p0, %p671_p13  ;;  %p677_p9 = scmp.lt.u32.totalorder %s675_s4, %s670_s29 }
  0x35   : > { %p679_p1 = scmp.lt.u32.totalorder %s670_s29, %s897_s27 }
  0x36   : > { %p674_p5 = pneg %p673_p3  ;;  %p678_p2 = por %p677_p9, %p676_p7 }
  0x38   : > { %p680_p4 = por %p679_p1, %p678_p2 }
  0x3a   : > { %p681_p6 = pnand %p680_p4, %p674_p5 }
  0x3c   : > { %684 = shalt.err (!%p681_p6)
}
  0x3d   : > { %s685_s7 = scalar_lea.vmem %s903_s22, 128  ;;  %s775_s18 = smov [#allocation2]  }
  0x3e   : > { %p686_p8 = scmp.ne.s32.totalorder %s903_s22, %s685_s7  ;;  %s690_s24 = sshll.u32 %s775_s18, 4  ;;  %s691_s24 = int_to_ptr.vmem [resolvable:$false] %s690_s24 }
  0x3f   : > { %s692_s25 = scalar_lea.vmem %s691_s24, 256  ;;  %p693_p3 = scmp.lt.s32.totalorder %s903_s22, %s691_s24 }
  0x40   : > { %p688_p10 = pnand %p686_p8, %p672_p0  ;;  %p694_p7 = scmp.lt.s32.totalorder %s692_s25, %s685_s7 }
  0x42   : > { %p689_p13 = pneg %p688_p10  ;;  %p695_p9 = por %p694_p7, %p693_p3 }
  0x44   : > { %p696_p2 = pnand %p695_p9, %p689_p13 }
  0x46   : > { %699 = shalt.err (!%p696_p2)
}
  0x47   : > { %589 = dma.hbm_to_vmem [thread:$0]  (!%p899_p11), %s897_s27, 128, %s903_s22, %s124_s28  }
  0x48   : > { %p1019_p5 = scmp.ne.s32.totalorder %s1014_s17, 0 }
  0x49   : > { %s933_s20 = sand.u32 (!%p1019_p5), 1, %s762_s10   ;;  %p1020_p0 = scmp.ne.s32.totalorder (!%p1019_p5), %s1012_s15, 0 }
  0x4a   : > { %143 = sbr.rel (%p1019_p5) target bundleno = 1178 (0x49a), region = 28  ;;  %s527_s26 = sshll.u32 (!%p1019_p5), %s933_s20, 3 }
  0x4b   : > { %s146_s19 = scalar_lea.sflag (!%p1019_p5), [#allocation3], %s933_s20  ;;  %s149_s29 = scalar_lea.vmem (!%p1019_p5), [#allocation2], %s527_s26 }
  0x51   : > { %745 = dma.done.wait (%p1020_p0), %s146_s19, 128  }
  0x52   : > { %747 = vsyncadd (%p1020_p0), %s146_s19, 4294967168  ;;  %p1021_p11 = scmp.eq.s32.totalorder %s818_s13, 0 }
  0x54   : > { %749 = dma.done.wait (%p1021_p11), [#allocation6], 512   ;;  %p1022_p1 = pmov %p1021_p11 }
  0x55   : > { %v776_v0 = vmov 0.0|0.0   ;;  %vm777_vm0 = vmmov 0   ;;  %v778_v1 = vmov 0.0   ;;  %v175_v2 = vld [vmem:[#allocation5] sm:$0xff]  ;;  %v176_v3 = vld [vmem:[#allocation5 + $0x8] sm:$0xff]  ;;  %v177_v4 = vld [vmem:[#allocation5 + $0x10] sm:$0xff]  ;;  %v331_v12 = vlaneseq }
  0x56   : > { %751 = vsyncadd (%p1022_p1), [#allocation6], 4294966784  ;;  %568 = vmatprep.subr.bf16.mxu0 %v776_v0  ;;  %555 = vmatprep.mubr.msk.f32.mxu0 %vm777_vm0, %v778_v1  ;;  %v569_v5 = vpack.c.bf16 %v176_v3, %v175_v2  ;;  %v178_v6 = vld [vmem:[#allocation5 + $0x18] sm:$0xff]  ;;  %vm179_vm1 = vcmask 261120   ;;  %s779_s15 = smov 112   ;;  %vm256_vm2 = vcmask 130048  }
  0x57   : > { %558 = vmatprep.subr.mxu1 %v778_v1  ;;  %560 = vmatprep.mubr.msk.f32.mxu1 %vm777_vm0, %v778_v1  ;;  %v572_v7 = vpack.c.bf16 %v178_v6, %v177_v4  ;;  %v174_v8 = vld [vmem:[%s149_s29] sm:$0xff]  ;;  %v332_v13 = vshrl.u32 %v331_v12, 7  ;;  %v334_v14 = vand.u32 127, %v331_v12  ;;  %vm337_vm4 = vcmask 64512   ;;  %s780_s17 = smov 96   ;;  %s535_s27 = sshll.u32 %s818_s13, 7 }
  0x58   : > { %570 = vmatpush3.bf16.msra.mxu0 %v569_v5  ;;  %s173_s22 = scalar_lea.vmem [#allocation7], %s527_s26  ;;  %s961_s3 = scalar_lea.hbm %s1008_s2, %s535_s27 }
  0x59   : > { %571 = vmatprep.subr.bf16.mxu0 %v776_v0  ;;  %vm335_vm3 = vcmp.le.s32.totalorder %v334_v14, %v332_v13  ;;  %s440_s23 = sshll.u32 %s173_s22, 4  ;;  %s427_s4 = scalar_lea.sflag [#allocation4], %s933_s20  ;;  %s963_s23 = int_to_ptr.vmem [resolvable:$true] %s440_s23 }
  0x5a   : > { %s700_s5 = scalar_lea.vmem %s963_s23, 128  ;;  %s781_s13 = smov [#allocation7]  }
  0x5b   : > { %p701_p4 = scmp.ne.s32.totalorder %s963_s23, %s700_s5  ;;  %s704_s6 = sshll.u32 %s781_s13, 4  ;;  %s705_s6 = int_to_ptr.vmem [resolvable:$false] %s704_s6 }
  0x5c   : > { %573 = vmatpush3.bf16.msra.mxu0 %v572_v7  ;;  %s706_s7 = scalar_lea.vmem %s705_s6, 256  ;;  %p707_p10 = scmp.lt.s32.totalorder %s963_s23, %s705_s6 }
  0x5d   : > { %p702_p6 = pnand %p701_p4, %p888_p12  ;;  %p708_p13 = scmp.lt.s32.totalorder %s706_s7, %s700_s5 }
  0x5f   : > { %556 = vmatmul.mubr.msk.f32.vlgmr.msra.gmra.mrb[0].mxu0 %vm179_vm1, %v174_v8  ;;  %p703_p8 = pneg %p702_p6  ;;  %p709_p3 = por %p708_p13, %p707_p10 }
  0x61   : > { %p710_p7 = pnand %p709_p3, %p703_p8 }
 0x132   : > { %v249_v9 = vpop.f32.mrb[0].mxu0 }
 0x133   : > { %254 = vrot.lane.b32.xlu0 %v249_v9, %s779_s15  ;;  %v557_v10 = vpop.f32.mrb[1].mxu0 }
 0x1a5   : > { %v255_v11 = vpop.permute.xlu0 %254 }
 0x1a6   : > { %559 = vmatpush3.xpose.msk.msra.mxu1 %vm256_vm2, %v255_v11 }
 0x1a7   : > { %563 = vmatprep.subr.mxu1 %v778_v1 }
 0x1a9   : > { %561 = vmatmul.mubr.msk.f32.vlgmr.msra.gmra.mrb[0].mxu1 %vm256_vm2, %v249_v9 }
 0x1aa   : > { %565 = vmatprep.mubr.msk.f32.mxu1 %vm777_vm0, %v778_v1 }
 0x27c   : > { %v327_v15 = vpop.f32.mrb[0].mxu1 }
 0x27d   : > { %v336_v16 = vsel %vm335_vm3, %v327_v15, -1e+30  ;;  %v562_v17 = vpop.f32.mrb[1].mxu1 }
 0x27e   : > { %v338_v18 = vsel %vm337_vm4, %v336_v16, -inf }
 0x27f   : > { %339 = vmax.xlane.f32.xlu0 %v338_v18 }
 0x30c   : > { %v340_v19 = vpop.xlane.xlu0 %339 }
 0x30d   : > { %v341_v20 = vsub.f32 %v336_v16, %v340_v19 }
 0x30f   : > { %v342_v21 = vmul.f32 1.442695, %v341_v20 }
 0x311   : > { %638 = vpow2.f32 %v342_v21 }
 0x31b   : > { %v639_v22 = vpop.eup %638 }
 0x31c   : > { %v344_v23 = vsel %vm337_vm4, %v639_v22, 0.0 }
 0x31d   : > { %345 = vadd.xlane.f32.xlu1 %v344_v23 }
 0x32e   : > { %349 = vrot.lane.b32.xlu1 %v249_v9, %s780_s17 }
 0x3aa   : > { %v346_v24 = vpop.xlane.xlu1 %345 }
 0x3ab   : > { %640 = vrcp.f32 %v346_v24 }
 0x3ae   : > { %v350_v25 = vpop.permute.xlu1 %349 }
 0x3af   : > { %564 = vmatpush3.msra.mxu1 %v350_v25 }
 0x3b5   : > { %v641_v26 = vpop.eup %640 }
 0x3b6   : > { %v348_v27 = vmul.f32 %v641_v26, %v639_v22 }
 0x3b8   : > { %566 = vmatmul.mubr.msk.f32.vlgmr.msra.gmra.mrb[2].mxu1 %vm337_vm4, %v348_v27 }
 0x48b   : > { %v421_v28 = vpop.f32.mrb[2].mxu1 }
 0x48c   : > { %425 = vst.msk [vmem:[%s173_s22] sm:$0xff] %vm256_vm2, %v421_v28  ;;  %v567_v29 = vpop.f32.mrb[3].mxu1 }
 0x48d   : > { %713 = shalt.err (!%p710_p7)
}
 0x48e   : > { %s714_s18 = scalar_lea.hbm %s961_s3, 128  ;;  %s718_s20 = scalar_lea.hbm %s1008_s2, 256 }
 0x48f   : > { %p715_p9 = scmp.ne.s32.totalorder %s961_s3, %s714_s18  ;;  %p719_p0 = scmp.lt.u32.totalorder %s961_s3, %s1008_s2 }
 0x490   : > { %p720_p11 = scmp.lt.u32.totalorder %s718_s20, %s714_s18  ;;  %p722_p4 = scmp.lt.u32.totalorder %s714_s18, %s961_s3 }
 0x491   : > { %p716_p2 = pnand %p715_p9, %p888_p12 }
 0x492   : > { %p721_p1 = por %p720_p11, %p719_p0 }
 0x493   : > { %p717_p5 = pneg %p716_p2 }
 0x494   : > { %p723_p6 = por %p722_p4, %p721_p1 }
 0x496   : > { %p724_p8 = pnand %p723_p6, %p717_p5 }
 0x498   : > { %727 = shalt.err (!%p724_p8)
}
 0x499   : > { %580 = dma.vmem_to_hbm [thread:$0]  (%p888_p12), %s963_s23, 128, %s961_s3, %s427_s4  }
 0x49a PF: > { %s452_s29 = sand.u32 1, %s758_s9   ;;  %p1023_p10 = scmp.ne.s32.totalorder %s1013_s16, 0 }
 0x49b   : > { %p1024_p13 = scmp.ge.s32.totalorder %s770_s12, 2  ;;  %s453_s15 = scalar_lea.sflag [#allocation4], %s452_s29 }
 0x49d   : > { %p591_p3 = pnand %p1024_p13, %p1023_p10 }
 0x49f   : > { %753 = dma.done.wait (!%p591_p3), %s453_s15, 128  }
 0x4a0   : > { %755 = vsyncadd (!%p591_p3), %s453_s15, 4294967168  ;;  %p16_p7 = scmp.ge.s32.totalorder %s853_s21, 4   ;;  %s1025_s9 = smov %s762_s10 }
 0x4a1   : > { %s1026_s10 = smov %s766_s11  ;;  %s1027_s11 = smov %s884_s8 }
 0x4a2   : > { %s1028_s12 = smov %s853_s21  ;;  %18 = sbr.rel (!%p16_p7) target bundleno = 6 (0x6), region = 77 }
 0x4a9   :  { %458 = vsyncpa [#allocation3], 1 }
 0x4aa   :  { %460 = vsyncpa [#allocation3 + $0x1], 1 }
 0x4ab   :  { %461 = vsyncpa [#allocation6], 1 }
 0x4ac   :  { %462 = vsyncpa [#allocation4], 1 }
 0x4ad   :  { %464 = vsyncpa [#allocation4 + $0x1], 1 }

</bundles_post_ra>
